<compile_context>
chip_gen: v6e
topology: v6e:2x2x1
jax: 0.10.0
libtpu: 0.0.40
codegen_flags: <defaults>
</compile_context>

<pallas_src>
import math

import jax
import jax.numpy as jnp
from jax.experimental import pallas as pl
from jax.experimental.pallas import tpu as pltpu


def _round_up(x: int, m: int) -> int:
    return ((x + m - 1) // m) * m


def _sinusoidal_kernel(time_ref, table_ref, out_ref):
    # time_ref : (TB, 1)   f32
    # table_ref: (2, dim)  f32   row 0 = [freqs | freqs], row 1 = [0 | pi/2]
    # out_ref  : (TB, dim) out_dtype
    t = time_ref[...]                             # (TB, 1)
    freq = table_ref[0:1, :]                      # (1, dim)
    phase = table_ref[1:2, :]                     # (1, dim)
    args = t * freq + phase                       # broadcast -> (TB, dim), f32
    # sin | cos in one transcendental via the phase shift; cast on the store
    # path (free pack) if the consumer wants bf16.
    out_ref[...] = jnp.sin(args).astype(out_ref.dtype)


def sinusoidal_position_embeddings(time: jax.Array, dim: int,
                                   out_dtype=jnp.float32) -> jax.Array:
    """Pallas equivalent of SinusoidalPositionEmbeddings(dim)(time).

    time: (B,) array of timesteps.
    returns: (B, dim) embeddings, [sin | cos] along the last axis.
    """
    assert dim % 2 == 0, "dim must be even"
    assert dim >= 4, "dim must be >= 4 (half_dim - 1 division)"
    half_dim = dim // 2
    b = time.shape[0]
    itemsize = jnp.dtype(out_dtype).itemsize

    # ---- hoisted constant table (built once per trace) ----------------------
    scale = math.log(10000.0) / (half_dim - 1)
    freqs = jnp.exp(jnp.arange(half_dim, dtype=jnp.float32) * (-scale))  # (half,)
    table = jnp.stack([
        jnp.concatenate([freqs, freqs]),                                  # freqs row
        jnp.concatenate([jnp.zeros((half_dim,), jnp.float32),
                         jnp.full((half_dim,), math.pi / 2.0, jnp.float32)]),
    ])                                                                    # (2, dim)

    time2d = time.astype(jnp.float32).reshape(b, 1)  # batch -> sublanes

    # ---- batch tile selection ------------------------------------------------
    # Output tile is double-buffered (2 * tb * dim * itemsize); keep it under a
    # conservative 16 MiB so we stay well inside v7x's 32 MiB scoped / 64 MiB
    # physical VMEM.  On v5e/v6e (128 MiB) this resolves to the 1024-row cap.
    OUT_VMEM_BUDGET = 16 * 1024 * 1024
    tb_cap = 8 * max(1, OUT_VMEM_BUDGET // (2 * 8 * dim * itemsize))
    tb_cap = min(tb_cap, 1024)   # >=512-row tiles already hit ~85% of HBM roofline

    problem_bytes = b * dim * itemsize
    if b <= 8 or (b <= tb_cap and problem_bytes <= (1 << 20)):
        tb = b                   # small problem: single block, one grid step
    else:
        # Force >= 2 grid steps so ("parallel",) can shard the batch across
        # v7x's two TensorCores, while respecting the VMEM-derived cap.
        tb = min(tb_cap, _round_up(pl.cdiv(b, 2), 8))

    grid = (pl.cdiv(b, tb),)

    out = pl.pallas_call(
        _sinusoidal_kernel,
        out_shape=jax.ShapeDtypeStruct((b, dim), out_dtype),
        grid_spec=pltpu.PrefetchScalarGridSpec(
            num_scalar_prefetch=0,
            grid=grid,
            in_specs=[
                pl.BlockSpec((tb, 1), lambda i: (i, 0)),    # time tile
                pl.BlockSpec((2, dim), lambda i: (0, 0)),   # fused freq/phase table
            ],
            out_specs=pl.BlockSpec((tb, dim), lambda i: (i, 0)),
        ),
        compiler_params=pltpu.CompilerParams(
            dimension_semantics=("parallel",),              # megacore on v7x
            vmem_limit_bytes=32 * 1024 * 1024,              # safe on all gens
        ),
    )(time2d, table)
    return out


def _reference(time: jax.Array, dim: int) -> jax.Array:
    half_dim = dim // 2
    emb = math.log(10000.0) / (half_dim - 1)
    emb = jnp.exp(jnp.arange(half_dim, dtype=jnp.float32) * -emb)
    emb = time.astype(jnp.float32)[:, None] * emb[None, :]
    return jnp.concatenate([jnp.sin(emb), jnp.cos(emb)], axis=-1)


if __name__ == "__main__":
    key = jax.random.PRNGKey(0)
    batch = 8
    dim = 128   # typical time-embed width; lane-dense (multiple of 128) output

    # deterministic example "timesteps" (typical diffusion range)
    time = jax.random.uniform(key, (batch,), dtype=jnp.float32,
                              minval=0.0, maxval=1000.0)

    out = sinusoidal_position_embeddings(time, dim)
    out = jax.block_until_ready(out)

    ref = _reference(time, dim)
    assert out.shape == (batch, dim)
    # atol=1e-4: sin(x + pi/2) vs cos(x) differs by <~5e-5 at args ~ 1000 (f32).
    assert jnp.allclose(out, ref, atol=1e-4, rtol=1e-5), "mismatch vs reference"

    print("KERNEL_OK")
</pallas_src>

<mosaic_0001>
module attributes {stable_mosaic.version = 11 : i64} {
  func.func @_sinusoidal_kernel(%arg0: i32, %arg1: memref<8x1xf32, #tpu.memory_space<vmem>>, %arg2: memref<2x128xf32, #tpu.memory_space<vmem>>, %arg3: memref<8x128xf32, #tpu.memory_space<vmem>>) attributes {dimension_semantics = [#tpu.dimension_semantics<parallel>], iteration_bounds = array<i64: 1>, scalar_prefetch = 0 : i64, scratch_operands = 0 : i64, tpu.core_type = #tpu.core_type<tc>, window_params = [{transform_indices = @transform_0, window_bounds = array<i64: 8, 1>}, {pipeline_mode = #tpu.pipeline_mode<synchronous>, transform_indices = @transform_1, window_bounds = array<i64: 2, 128>}, {transform_indices = @transform_2, window_bounds = array<i64: 8, 128>}]} {
    %c0 = arith.constant 0 : index
    %c0_0 = arith.constant 0 : index
    %0 = vector.load %arg1[%c0, %c0_0] : memref<8x1xf32, #tpu.memory_space<vmem>>, vector<8x1xf32>
    %c0_1 = arith.constant 0 : index
    %c0_2 = arith.constant 0 : index
    %1 = vector.load %arg2[%c0_1, %c0_2] : memref<2x128xf32, #tpu.memory_space<vmem>>, vector<1x128xf32>
    %c1 = arith.constant 1 : index
    %c0_3 = arith.constant 0 : index
    %2 = vector.load %arg2[%c1, %c0_3] : memref<2x128xf32, #tpu.memory_space<vmem>>, vector<1x128xf32>
    %3 = vector.broadcast %0 : vector<8x1xf32> to vector<8x128xf32>
    %4 = vector.broadcast %1 : vector<1x128xf32> to vector<8x128xf32>
    %5 = arith.mulf %3, %4 : vector<8x128xf32>
    %6 = vector.broadcast %2 : vector<1x128xf32> to vector<8x128xf32>
    %7 = arith.addf %5, %6 : vector<8x128xf32>
    %8 = math.sin %7 : vector<8x128xf32>
    %c0_4 = arith.constant 0 : index
    %c0_5 = arith.constant 0 : index
    %9 = vector.load %arg3[%c0_4, %c0_5] : memref<8x128xf32, #tpu.memory_space<vmem>>, vector<8x128xf32>
    tpu.vector_store %arg3[%c0_4, %c0_5], %8 {strides = array<i32>} : memref<8x128xf32, #tpu.memory_space<vmem>>, vector<8x128xf32>,
    return
  }
  func.func @transform_0(%arg0: i32) -> (i32, i32) {
    %c0_i32 = arith.constant 0 : i32
    %c0_i32_0 = arith.constant 0 : i32
    return %arg0, %c0_i32 : i32, i32
  }
  func.func @transform_1(%arg0: i32) -> (i32, i32) {
    %c0_i32 = arith.constant 0 : i32
    %c0_i32_0 = arith.constant 0 : i32
    %c0_i32_1 = arith.constant 0 : i32
    return %c0_i32, %c0_i32_0 : i32, i32
  }
  func.func @transform_2(%arg0: i32) -> (i32, i32) {
    %c0_i32 = arith.constant 0 : i32
    %c0_i32_0 = arith.constant 0 : i32
    return %arg0, %c0_i32 : i32, i32
  }
}

</mosaic_0001>

<bundles_post_ra>
// kernel: tpu_custom_call.1
= control target key start
LH: loop header
LB: loop body
LE: loop exit
PB: predicated region body
PF: predicated region fallthrough
CT: control target
= control target key end

     0   :  { %v194_v1 = vmov 0   ;;  %s250_s0 = inlined_call_operand.vmem [shape: f32[8,1], index: 0, kind: input, shape index: {}]   ;;  %s251_s1 = inlined_call_operand.vmem [shape: f32[2,128], index: 1, kind: input, shape index: {}]   ;;  %s252_s2 = inlined_call_operand.hbm [shape: f32[8,128], index: 2, kind: output, shape index: {}]  }
   0x1   :  { %v12_v0 = vld [vmem:[%s250_s0] sm:$0xff]  ;;  %167 = vset.pattern.permute.xlu0 %v194_v1 }
   0x2   :  { %17 = vperm.xlu0 %167, %v12_v0  }
   0x3   :  { %7 = vsyncpa [#allocation3], 0  ;;  %v149_v2 = vld [vmem:[%s251_s1] ss:$0 sm:$0xff]  ;;  %v150_v3 = vld [vmem:[%s251_s1 + $0x1] ss:$0 sm:$0xff] }
   0x4   :  { %v195_v18 = vmov 2102212464   ;;  %v196_v20 = vmov 920167782   ;;  %v197_v24 = vmov 1326507024  }
   0x5   :  { %v198_v26 = vmov 683565275   ;;  %v199_v28 = vmov 2475754826   ;;  %v200_v31 = vmov 2131351028  }
   0x6   :  { %s201_s0 = smov [#allocation2]  }
   0x7   :  { %s141_s1 = sshll.u32 %s201_s0, 4  ;;  %s142_s1 = int_to_ptr.vmem [resolvable:$true] %s141_s1 }
   0x8   :  { %s172_s15 = scalar_lea.vmem %s142_s1, 128  ;;  %p177_p1 = scmp.lt.s32.totalorder %s142_s1, %s142_s1 }
   0x9   :  { %p173_p0 = scmp.ne.s32.totalorder %s142_s1, %s172_s15  ;;  %p178_p2 = scmp.lt.s32.totalorder %s172_s15, %s172_s15 }
   0xb   :  { %p179_p3 = por %p178_p2, %p177_p1 }
   0xd   :  { %p180_p4 = pnand %p179_p3, %p173_p0 }
  0x7d   :  { %v18_v4 = vpop.permute.xlu0 %17 }
  0x7e   :  { %v24_v5 = vmul.f32 %v149_v2, %v18_v4 }
  0x80   :  { %v226_v6 = vadd.f32 %v150_v3, %v24_v5 }
  0x82   :  { %v33_v7 = vand.u32 2139095040, %v226_v6  ;;  %v30_v8 = vand.u32 2147483647, %v226_v6  ;;  %vm32_vm7 = vcmp.lt.s32.totalorder %v226_v6, 0  ;;  %vm122_vm12 = vweird.f32 %v226_v6 }
  0x84   :  { %v34_v9 = vshrl.u32 %v33_v7, 23  ;;  %v37_v11 = vand.u32 8388607, %v30_v8  ;;  %vm31_vm8 = vcmp.le.f32.partialorder %v30_v8, 0.7853982 }
  0x86   :  { %v151_v10 = vadd.s32 4294967169, %v34_v9  ;;  %v38_v14 = vor.u32 8388608, %v37_v11 }
  0x88   :  { %v40_v12 = vadd.s32 1, %v151_v10  ;;  %v78_v22 = vshll.u32 %v38_v14, 8 }
  0x8a   :  { %vm41_vm0 = vcmp.gt.s32.totalorder %v40_v12, 0 }
  0x8b   :  { %v42_v13 = vsel %vm41_vm0, %v40_v12, 0 }
  0x8c   :  { %v44_v15 = vand.u32 31, %v42_v13  ;;  %v43_v16 = vshrl.u32 %v42_v13, 5 }
  0x8e   :  { %v45_v17 = vsub.s32 32, %v44_v15  ;;  %v56_v19 = vshll.u32 %v195_v18, %v44_v15  ;;  %v59_v21 = vshll.u32 %v196_v20, %v44_v15  ;;  %v47_v27 = vshll.u32 %v198_v26, %v44_v15 }
  0x8f   :  { %v50_v30 = vshll.u32 %v199_v28, %v44_v15  ;;  %v53_v33 = vshll.u32 %v200_v31, %v44_v15  ;;  %vm65_vm1 = vcmp.lt.s32.totalorder %v43_v16, 4  ;;  %vm62_vm2 = vcmp.lt.s32.totalorder %v43_v16, 1 }
  0x90   :  { %v57_v23 = vshrl.u32 %v196_v20, %v45_v17  ;;  %v60_v25 = vshrl.u32 %v197_v24, %v45_v17  ;;  %v48_v29 = vshrl.u32 %v199_v28, %v45_v17  ;;  %v51_v32 = vshrl.u32 %v200_v31, %v45_v17 }
  0x91   :  { %v54_v34 = vshrl.u32 %v195_v18, %v45_v17  ;;  %v46_v38 = vshrl.u32 %v198_v26, %v45_v17  ;;  %vm63_vm3 = vcmp.lt.s32.totalorder %v43_v16, 2  ;;  %vm64_vm4 = vcmp.lt.s32.totalorder %v43_v16, 3 }
  0x92   :  { %v58_v35 = vor.u32 %v57_v23, %v56_v19  ;;  %v61_v36 = vor.u32 %v60_v25, %v59_v21  ;;  %v49_v37 = vor.u32 %v48_v29, %v47_v27  ;;  %v52_v39 = vor.u32 %v51_v32, %v50_v30 }
  0x93   :  { %v55_v40 = vor.u32 %v54_v34, %v53_v33 }
  0x94   :  { %v71_v41 = vsel %vm65_vm1, %v58_v35, 920167782  ;;  %v75_v42 = vsel %vm65_vm1, %v61_v36, 1326507024  ;;  %v70_v44 = vsel %vm62_vm2, %v49_v37, %v52_v39  ;;  %v66_v47 = vsel %vm62_vm2, %v46_v38, %v49_v37 }
  0x95   :  { %v67_v43 = vsel %vm65_vm1, %v55_v40, 2102212464  ;;  %v72_v45 = vsel %vm64_vm4, %v55_v40, %v71_v41  ;;  %v74_v46 = vsel %vm62_vm2, %v52_v39, %v55_v40  ;;  %v76_v50 = vsel %vm64_vm4, %v58_v35, %v75_v42 }
  0x96   :  { %v68_v48 = vsel %vm64_vm4, %v52_v39, %v67_v43  ;;  %v73_v49 = vsel %vm63_vm3, %v70_v44, %v72_v45  ;;  %v77_v51 = vsel %vm63_vm3, %v74_v46, %v76_v50 }
  0x97   :  { %v232_v52 = vmul.u32.u64.low %v78_v22, %v73_v49  ;;  %v233_v53 = vmul.u32.u64.high %v78_v22, %v73_v49, %v232_v52  ;;  %v235_v54 = vmul.u32.u64.low %v78_v22, %v77_v51  ;;  %v236_v55 = vmul.u32.u64.high %v78_v22, %v77_v51, %v235_v54 }
  0x98   :  { %v69_v56 = vsel %vm63_vm3, %v66_v47, %v68_v48 }
  0x99   :  { %v88_v57 = vadd.s32 1, %v233_v53  ;;  %v85_v58 = vmul.u32 %v78_v22, %v69_v56  ;;  %vm87_vm5 = vc.u32 %v236_v55, %v232_v52  ;;  %v86_v7 = vadd.s32 %v232_v52, %v236_v55 }
  0x9b   :  { %v89_v59 = vsel %vm87_vm5, %v88_v57, %v233_v53 }
  0x9c   :  { %v90_v60 = vadd.s32 %v89_v59, %v85_v58 }
  0x9e   :  { %v91_v61 = vadd.s32 536870912, %v90_v60 }
  0xa0   :  { %v92_v62 = vshrl.u32 %v91_v61, 30 }
  0xa2   :  { %v93_v63 = vshll.u32 %v92_v62, 30  ;;  %v116_v21 = vsub.s32 4, %v92_v62 }
  0xa4   :  { %v94_v0 = vsub.s32 %v90_v60, %v93_v63  ;;  %v117_v24 = vsel %vm32_vm7, %v116_v21, %v92_v62 }
  0xa5   :  { %v119_v25 = vsel %vm31_vm8, 0, %v117_v24 }
  0xa6   :  { %v96_v1 = vsub.s32 0, %v94_v0  ;;  %v123_v26 = vadd.s32 3, %v119_v25 }
  0xa8   :  { %v152_v2 = vmin.u32 %v96_v1, %v94_v0  ;;  %v124_v27 = vand.u32 3, %v123_v26 }
  0xaa   :  { %v98_v3 = vclz %v152_v2  ;;  %vm129_vm9 = vcmp.eq.s32.totalorder %v124_v27, 2  ;;  %vm126_vm10 = vcmp.eq.s32.totalorder %v124_v27, 0  ;;  %vm125_vm11 = vcmp.lt.s32.totalorder %v124_v27, 2 }
  0xac   :  { %v153_v4 = vadd.s32 4294967294, %v98_v3 }
  0xae   :  { %vm154_vm6 = vcmp.lt.s32.totalorder %v153_v4, 0 }
  0xaf   :  { %v101_v5 = vsel %vm154_vm6, 0, %v153_v4 }
  0xb0   :  { %v102_v9 = vsub.s32 32, %v101_v5  ;;  %v106_v10 = vsub.s32 4294967266, %v101_v5  ;;  %v103_v11 = vshll.u32 %v94_v0, %v101_v5 }
  0xb2   :  { %v104_v12 = vshrl.u32 %v86_v7, %v102_v9  ;;  %v107_v13 = vadd.s32 127, %v106_v10 }
  0xb4   :  { %v105_v14 = vor.u32 %v104_v12, %v103_v11  ;;  %v108_v15 = vshll.u32 %v107_v13, 23 }
  0xb6   :  { %v109_v16 = vor.u32 4788187, %v108_v15  ;;  %v112_v18 = vcvt.s32.f32 %v105_v14 }
  0xb8   :  { %v110_v17 = vand.u32 2147483647, %v109_v16 }
  0xba   :  { %v113_v19 = vmul.f32 %v112_v18, %v110_v17 }
  0xbc   :  { %v114_v20 = vxor.u32 2147483648, %v113_v19 }
  0xbe   :  { %v115_v22 = vsel %vm32_vm7, %v114_v20, %v113_v19 }
  0xbf   :  { %v118_v23 = vsel %vm31_vm8, %v226_v6, %v115_v22 }
  0xc0   :  { %168 = vcosq.f32 %v118_v23 }
  0xc1   :  { %170 = vsinq.f32 %v118_v23 }
  0xcd   :  { %v169_v28 = vpop.eup %168 }
  0xce   :  { %v171_v29 = vpop.eup %170  ;;  %v130_v30 = vxor.u32 2147483648, %v169_v28 }
  0xcf   :  { %v127_v31 = vxor.u32 2147483648, %v171_v29 }
  0xd0   :  { %v131_v32 = vsel %vm129_vm9, %v130_v30, %v171_v29 }
  0xd1   :  { %v128_v8 = vsel %vm126_vm10, %v169_v28, %v127_v31 }
  0xd2   :  { %v132_v33 = vsel %vm125_vm11, %v128_v8, %v131_v32 }
  0xd3   :  { %v133_v34 = vsel %vm122_vm12, nan, %v132_v33 }
  0xd4   :  { %134 = vst [vmem:[#allocation2] sm:$0xff] %v133_v34 }
  0xd5   :  { %183 = shalt.err (!%p180_p4)
}
  0xd6   :  { %144 = dma.vmem_to_hbm [thread:$0]  %s142_s1, 128, %s252_s2, [#allocation3]  }
  0xd7   :  { %192 = dma.done.wait [#allocation3], 128  }
  0xd8   :  { %193 = vsyncadd [#allocation3], 4294967168 }
  0xd9   :  { %148 = vsyncpa [#allocation3], 1 }

</bundles_post_ra>
